<compile_context>
chip_gen: v5e
topology: v5e:2x2
jax: 0.10.0
libtpu: 0.0.40
codegen_flags: <defaults>
</compile_context>

<pallas_src>
import jax
import jax.numpy as jnp
from jax.experimental import pallas as pl
from jax.experimental.pallas import tpu as pltpu


def _round_up(x, m):
    return ((x + m - 1) // m) * m


def _fused_linear_kernel(x_ref, w_ref, b_ref, o_ref):
    # x: (tb, feat), w: (feat, out_feat), b: (1, out_feat)
    y = jnp.dot(x_ref[...], w_ref[...], preferred_element_type=jnp.float32)
    o_ref[...] = (y + b_ref[...]).astype(o_ref.dtype)


def _fused_linear_call(x, w, b, *, block_rows):
    """Single fused linear: (rows, feat) @ (feat, out_feat) + (1, out_feat)."""
    rows, feat = x.shape
    out_feat = w.shape[1]

    if rows <= 8:
        # One block covering the whole (tiny) array; block dims == array dims.
        tb = rows
    else:
        # Multiple of 8 sublanes; aim for >= 2 grid steps so v7x megacore
        # ("parallel" axis) can shard the batch across both TensorCores.
        tb = max(8, min(block_rows, _round_up(pl.cdiv(rows, 2), 8)))
    grid = (pl.cdiv(rows, tb),)  # ragged last block handled by Pallas clipping

    cost = pl.CostEstimate(
        flops=2 * rows * feat * out_feat,
        transcendentals=0,
        bytes_accessed=4 * (rows * feat + rows * out_feat
                            + feat * out_feat + out_feat),
    )

    return pl.pallas_call(
        _fused_linear_kernel,
        out_shape=jax.ShapeDtypeStruct((rows, out_feat), x.dtype),
        grid=grid,
        in_specs=[
            # x: one batch tile per grid step.
            pl.BlockSpec((tb, feat), lambda i: (i, 0),
                         memory_space=pltpu.MemorySpace.VMEM),
            # fused weight / bias stay resident across all steps.
            pl.BlockSpec((feat, out_feat), lambda i: (0, 0),
                         memory_space=pltpu.MemorySpace.VMEM),
            pl.BlockSpec((1, out_feat), lambda i: (0, 0),
                         memory_space=pltpu.MemorySpace.VMEM),
        ],
        out_specs=pl.BlockSpec((tb, out_feat), lambda i: (i, 0),
                               memory_space=pltpu.MemorySpace.VMEM),
        compiler_params=pltpu.CompilerParams(
            dimension_semantics=("parallel",),
            vmem_limit_bytes=32 * 1024 * 1024,
        ),
        cost_estimate=cost,
    )(x, w, b)


def make_linear_regression_nn(w1, b1, w2, b2, *, block_b=32768):
    """Precompute fused / lane-densified params once; return forward(x).

    Weights are stored pre-transposed relative to PyTorch (fc.weight is
    (out, in)); i.e. w1 == fc1.weight.T (in, 3), w2 == fc2.weight.T (3, out).
    """
    in_size = int(w1.shape[0])
    out_size = int(w2.shape[1])
    f32 = jnp.float32

    # Exact algebraic fusion of the two linear layers (no nonlinearity between).
    w_fused = jnp.dot(w1.astype(f32), w2.astype(f32))                     # (in, out)
    b_fused = (jnp.dot(b1.astype(f32), w2.astype(f32))
               + b2.astype(f32)).reshape(1, -1)                           # (1, out)

    # 8x lane-densified variant: x (B, in) reinterpreted row-major as
    # (B/8, 8*in); block-diagonal weight so each packed row yields 8 outputs.
    pack = 8
    w_dense = jnp.kron(jnp.eye(pack, dtype=f32), w_fused)                 # (8*in, 8*out)
    b_dense = jnp.tile(b_fused, (1, pack))                                # (1, 8*out)

    # Materialize fused params once (setup time), not per forward call.
    w_fused, b_fused, w_dense, b_dense = jax.block_until_ready(
        (w_fused, b_fused, w_dense, b_dense))

    block_rows_dense = max(1, block_b // pack)

    def _forward(x):
        B = x.shape[0]
        if B > 0 and B % pack == 0:
            # Free row-major reinterpretation: same HBM bytes / layout.
            xr = x.reshape(B // pack, pack * in_size)
            yr = _fused_linear_call(xr, w_dense, b_dense,
                                    block_rows=block_rows_dense)          # (B/8, 8*out)
            return yr.reshape(B, out_size)
        # Fallback for B not a multiple of 8: plain 16-lane path.
        return _fused_linear_call(x, w_fused, b_fused, block_rows=block_b)

    return jax.jit(_forward)


def linear_regression_nn(x, w1, b1, w2, b2, *, block_b=32768):
    """One-shot convenience wrapper (params fused on every call)."""
    return make_linear_regression_nn(w1, b1, w2, b2, block_b=block_b)(x)


if __name__ == "__main__":
    in_size, hidden, out_size = 16, 3, 4

    key = jax.random.PRNGKey(0)
    kx, k1, k2, k3, k4, kx2, kx3 = jax.random.split(key, 7)

    # Deterministic parameter init (mimics nn.Linear's uniform(-1/sqrt(fan_in), ...)).
    bound1 = 1.0 / jnp.sqrt(in_size)
    bound2 = 1.0 / jnp.sqrt(hidden)
    # Stored pre-transposed relative to PyTorch (fc.weight is (out, in)).
    w1 = jax.random.uniform(k1, (in_size, hidden), jnp.float32, -bound1, bound1)
    b1 = jax.random.uniform(k2, (hidden,), jnp.float32, -bound1, bound1)
    w2 = jax.random.uniform(k3, (hidden, out_size), jnp.float32, -bound2, bound2)
    b2 = jax.random.uniform(k4, (out_size,), jnp.float32, -bound2, bound2)

    forward = make_linear_regression_nn(w1, b1, w2, b2)

    def ref_fn(x):
        # Reference: the original (unfused) two-layer forward in plain JAX.
        return (x @ w1 + b1) @ w2 + b2

    # 1) Small batch: lane-dense path, single grid step.
    x = jax.random.normal(kx, (8, in_size), jnp.float32)
    out = jax.block_until_ready(forward(x))
    assert out.shape == (8, out_size)
    assert jnp.allclose(out, ref_fn(x), atol=1e-5, rtol=1e-5)

    # 2) Larger batch: lane-dense path, >=2 grid steps + ragged last block.
    x_big = jax.random.normal(kx2, (1000, in_size), jnp.float32)
    out_big = jax.block_until_ready(forward(x_big))
    assert out_big.shape == (1000, out_size)
    assert jnp.allclose(out_big, ref_fn(x_big), atol=1e-5, rtol=1e-5)

    # 3) Batch not a multiple of 8: plain fallback path, ragged grid, no pad/slice.
    x_odd = jax.random.normal(kx3, (13, in_size), jnp.float32)
    out_odd = jax.block_until_ready(forward(x_odd))
    assert out_odd.shape == (13, out_size)
    assert jnp.allclose(out_odd, ref_fn(x_odd), atol=1e-5, rtol=1e-5)

    print("KERNEL_OK")
</pallas_src>

<mosaic_0001>
module attributes {stable_mosaic.version = 11 : i64} {
  func.func @_fused_linear_kernel(%arg0: i32, %arg1: memref<1x128xf32, #tpu.memory_space<vmem>>, %arg2: memref<128x32xf32, #tpu.memory_space<vmem>>, %arg3: memref<1x32xf32, #tpu.memory_space<vmem>>, %arg4: memref<1x32xf32, #tpu.memory_space<vmem>>) attributes {dimension_semantics = [#tpu.dimension_semantics<parallel>], iteration_bounds = array<i64: 1>, scalar_prefetch = 0 : i64, scratch_operands = 0 : i64, tpu.core_type = #tpu.core_type<tc>, window_params = [{transform_indices = @transform_0, window_bounds = array<i64: 1, 128>}, {pipeline_mode = #tpu.pipeline_mode<synchronous>, transform_indices = @transform_1, window_bounds = array<i64: 128, 32>}, {pipeline_mode = #tpu.pipeline_mode<synchronous>, transform_indices = @transform_2, window_bounds = array<i64: 1, 32>}, {transform_indices = @transform_3, window_bounds = array<i64: 1, 32>}]} {
    %c0 = arith.constant 0 : index
    %c0_0 = arith.constant 0 : index
    %0 = vector.load %arg1[%c0, %c0_0] : memref<1x128xf32, #tpu.memory_space<vmem>>, vector<1x128xf32>
    %c0_1 = arith.constant 0 : index
    %c0_2 = arith.constant 0 : index
    %1 = vector.load %arg2[%c0_1, %c0_2] : memref<128x32xf32, #tpu.memory_space<vmem>>, vector<128x32xf32>
    %cst = arith.constant dense<0.000000e+00> : vector<1x32xf32>
    %2 = tpu.matmul %0, %1, %cst {dimension_numbers = #tpu.dot_dimension_numbers<[1], [0], [0], [1], [0, 0, 1, 1], [], []>} : vector<1x128xf32>, vector<128x32xf32>, vector<1x32xf32> -> vector<1x32xf32>
    %c0_3 = arith.constant 0 : index
    %c0_4 = arith.constant 0 : index
    %3 = vector.load %arg3[%c0_3, %c0_4] : memref<1x32xf32, #tpu.memory_space<vmem>>, vector<1x32xf32>
    %4 = arith.addf %2, %3 : vector<1x32xf32>
    %c0_5 = arith.constant 0 : index
    %c0_6 = arith.constant 0 : index
    %5 = vector.load %arg4[%c0_5, %c0_6] : memref<1x32xf32, #tpu.memory_space<vmem>>, vector<1x32xf32>
    tpu.vector_store %arg4[%c0_5, %c0_6], %4 {strides = array<i32>} : memref<1x32xf32, #tpu.memory_space<vmem>>, vector<1x32xf32>,
    return
  }
  func.func @transform_0(%arg0: i32) -> (i32, i32) {
    %c0_i32 = arith.constant 0 : i32
    %c0_i32_0 = arith.constant 0 : i32
    return %arg0, %c0_i32 : i32, i32
  }
  func.func @transform_1(%arg0: i32) -> (i32, i32) {
    %c0_i32 = arith.constant 0 : i32
    %c0_i32_0 = arith.constant 0 : i32
    %c0_i32_1 = arith.constant 0 : i32
    return %c0_i32, %c0_i32_0 : i32, i32
  }
  func.func @transform_2(%arg0: i32) -> (i32, i32) {
    %c0_i32 = arith.constant 0 : i32
    %c0_i32_0 = arith.constant 0 : i32
    %c0_i32_1 = arith.constant 0 : i32
    return %c0_i32, %c0_i32_0 : i32, i32
  }
  func.func @transform_3(%arg0: i32) -> (i32, i32) {
    %c0_i32 = arith.constant 0 : i32
    %c0_i32_0 = arith.constant 0 : i32
    return %arg0, %c0_i32 : i32, i32
  }
}

</mosaic_0001>

<bundles_post_ra>
// kernel: _forward.1
= control target key start
LH: loop header
LB: loop body
LE: loop exit
PB: predicated region body
PF: predicated region fallthrough
CT: control target
= control target key end

     0   :  { %8 = vsyncpa [#allocation3], 0  ;;  %s104_s15 = smov [#allocation2]   ;;  %s105_s17 = smov 128   ;;  %s139_s0 = inlined_call_operand.vmem [shape: f32[1,128], index: 0, kind: input, shape index: {}]   ;;  %s140_s1 = inlined_call_operand.hbm [shape: f32[128,32], index: 1, kind: input, shape index: {}]   ;;  %s141_s2 = inlined_call_operand.vmem [shape: f32[1,32], index: 2, kind: input, shape index: {}]   ;;  %s142_s3 = inlined_call_operand.vmem [shape: f32[1,32], index: 3, kind: output, shape index: {}]  }
   0x1   :  { %s15_s14 = sshll.u32 %s140_s1, 4  ;;  %s17_s16 = sshll.u32 %s104_s15, 4  ;;  %s16_s14 = int_to_ptr.hbm [resolvable:$true] %s15_s14  ;;  %s18_s16 = int_to_ptr.vmem [resolvable:$true] %s17_s16 }
   0x2   :  { %s106_s18 = smov 8  }
   0x3   :  { %23 = dma.hbm_to_vmem [thread:$0]  %s16_s14, 2048, %s18_s16, [#allocation3], %s105_s17, %s105_s17, %s106_s18  }
   0x4   :  { %102 = dma.done.wait [#allocation3], 2048  }
   0x5   :  { %103 = vsyncadd [#allocation3], 4294965248  ;;  %v46_v0 = vld [vmem:[#allocation2 + $0x78] sm:$0xff]  ;;  %v45_v1 = vld [vmem:[#allocation2 + $0x70] sm:$0xff]  ;;  %vm68_vm0 = vcmask 253952  }
   0x6   :  { %48 = vmatpush.msra.mxu0 %v46_v0  ;;  %v44_v2 = vld [vmem:[#allocation2 + $0x68] sm:$0xff]  ;;  %v43_v3 = vld [vmem:[#allocation2 + $0x60] sm:$0xff]  ;;  %v42_v4 = vld [vmem:[#allocation2 + $0x58] sm:$0xff] }
   0x7   :  { %v41_v5 = vld [vmem:[#allocation2 + $0x50] sm:$0xff]  ;;  %v40_v6 = vld [vmem:[#allocation2 + $0x48] sm:$0xff]  ;;  %v39_v7 = vld [vmem:[#allocation2 + $0x40] sm:$0xff] }
   0x8   :  { %49 = vmatpush.msra.mxu0 %v45_v1  ;;  %v38_v8 = vld [vmem:[#allocation2 + $0x38] sm:$0xff]  ;;  %v37_v9 = vld [vmem:[#allocation2 + $0x30] sm:$0xff]  ;;  %v36_v10 = vld [vmem:[#allocation2 + $0x28] sm:$0xff] }
   0x9   :  { %v35_v11 = vld [vmem:[#allocation2 + $0x20] sm:$0xff]  ;;  %v34_v12 = vld [vmem:[#allocation2 + $0x18] sm:$0xff]  ;;  %v33_v13 = vld [vmem:[#allocation2 + $0x10] sm:$0xff] }
   0xa   :  { %50 = vmatpush.msra.mxu0 %v44_v2  ;;  %v32_v14 = vld [vmem:[#allocation2 + $0x8] sm:$0xff]  ;;  %v31_v15 = vld [vmem:[#allocation2] sm:$0xff] }
   0xb   :  { %v30_v16 = vld [vmem:[%s139_s0] sm:$0x1] }
   0xc   :  { %51 = vmatpush.msra.mxu0 %v43_v3  ;;  %v47_v17 = vld [vmem:[%s141_s2] sm:$0x1] }
   0xe   :  { %52 = vmatpush.msra.mxu0 %v42_v4 }
  0x10   :  { %53 = vmatpush.msra.mxu0 %v41_v5 }
  0x12   :  { %54 = vmatpush.msra.mxu0 %v40_v6 }
  0x14   :  { %55 = vmatpush.msra.mxu0 %v39_v7 }
  0x16   :  { %56 = vmatpush.msra.mxu0 %v38_v8 }
  0x18   :  { %57 = vmatpush.msra.mxu0 %v37_v9 }
  0x1a   :  { %58 = vmatpush.msra.mxu0 %v36_v10 }
  0x1c   :  { %59 = vmatpush.msra.mxu0 %v35_v11 }
  0x1e   :  { %60 = vmatpush.msra.mxu0 %v34_v12 }
  0x20   :  { %61 = vmatpush.msra.mxu0 %v33_v13 }
  0x22   :  { %62 = vmatpush.msra.mxu0 %v32_v14 }
  0x24   :  { %63 = vmatpush.msra.mxu0 %v31_v15 }
  0x25   :  { %64 = vmatmul.f32.vlgmr.msra.gmra.mxu0 %v30_v16 }
  0xa2   :  { %v65_v18 = vpop.f32.mrf.mxu0 }
  0xa3   :  { %v66_v19 = vadd.f32 %v65_v18, %v47_v17 }
  0xa5   :  { %69 = vst.msk [vmem:[%s142_s3] sm:$0x1] %vm68_vm0, %v66_v19 }
  0xa6   :  { %74 = vsyncpa [#allocation3], 1 }

</bundles_post_ra>
